<compile_context>
chip_gen: v6e
topology: v6e:2x2x1
jax: 0.10.0
libtpu: 0.0.40
codegen_flags: <defaults>
</compile_context>

<pallas_src>
import jax
import jax.numpy as jnp
from jax.experimental import pallas as pl
from jax.experimental.pallas import tpu as pltpu

BN_EPS = 1e-5
LANE = 128
TILE_M_MAX = 1024   # rows per tile; ~1.8 MB of VMEM buffers, near HBM roofline


def _round_up(v, m):
    return (v + m - 1) // m * m


# --------------------------------------------------------------------------
# Pallas kernels
# --------------------------------------------------------------------------
def _conv_stats_kernel(x_ref, w_ref, part_ref):
    """Pass 1: 1x1-conv matmul (bf16 in, f32 acc) -> per-tile BN partial stats.

    The conv result stays in VMEM/vregs; only an (8, Cout_pad) lane-dense slab
    of partial statistics is written per tile (row 0 = sum, row 1 = sum-of-sq).
    """
    y = jnp.dot(x_ref[...], w_ref[...], preferred_element_type=jnp.float32)
    s = jnp.sum(y, axis=0, keepdims=True)        # (1, C_pad)
    ss = jnp.sum(y * y, axis=0, keepdims=True)   # (1, C_pad)
    row = jax.lax.broadcasted_iota(jnp.int32, (8, 1), 0)
    part_ref[...] = jnp.where(row == 0, s, 0.0) + jnp.where(row == 1, ss, 0.0)


def _conv_bn_kernel(x_ref, w_ref, scale_ref, shift_ref, out_ref):
    """Pass 2: fused 1x1-conv matmul + per-channel affine (BN normalize)."""
    y = jnp.dot(x_ref[...], w_ref[...], preferred_element_type=jnp.float32)
    out_ref[...] = y * scale_ref[...] + shift_ref[...]


# --------------------------------------------------------------------------
# pallas_call wrappers (tiled 1-D grid over M, fully parallel)
# --------------------------------------------------------------------------
def _run_stats(x2, w2, tile_m):
    m_pad, cin_p = x2.shape
    cout_p = w2.shape[1]
    num_tiles = m_pad // tile_m
    flops = 2 * m_pad * cin_p * cout_p
    bytes_accessed = x2.size * 2 + w2.size * 2 + num_tiles * 8 * cout_p * 4
    return pl.pallas_call(
        _conv_stats_kernel,
        grid=(num_tiles,),
        in_specs=[pl.BlockSpec((tile_m, cin_p), lambda i: (i, 0)),
                  pl.BlockSpec((cin_p, cout_p), lambda i: (0, 0))],
        out_specs=pl.BlockSpec((8, cout_p), lambda i: (i, 0)),
        out_shape=jax.ShapeDtypeStruct((num_tiles * 8, cout_p), jnp.float32),
        compiler_params=pltpu.CompilerParams(dimension_semantics=("parallel",)),
        cost_estimate=pl.CostEstimate(flops=flops, transcendentals=0,
                                      bytes_accessed=bytes_accessed),
    )(x2, w2)


def _run_conv_bn(x2, w2, scale, shift, tile_m):
    m_pad, cin_p = x2.shape
    cout_p = w2.shape[1]
    num_tiles = m_pad // tile_m
    flops = 2 * m_pad * cin_p * cout_p + 2 * m_pad * cout_p
    bytes_accessed = (x2.size * 2 + w2.size * 2 + 2 * cout_p * 4
                      + m_pad * cout_p * 4)
    return pl.pallas_call(
        _conv_bn_kernel,
        grid=(num_tiles,),
        in_specs=[pl.BlockSpec((tile_m, cin_p), lambda i: (i, 0)),
                  pl.BlockSpec((cin_p, cout_p), lambda i: (0, 0)),
                  pl.BlockSpec((1, cout_p), lambda i: (0, 0)),
                  pl.BlockSpec((1, cout_p), lambda i: (0, 0))],
        out_specs=pl.BlockSpec((tile_m, cout_p), lambda i: (i, 0)),
        out_shape=jax.ShapeDtypeStruct((m_pad, cout_p), jnp.float32),
        compiler_params=pltpu.CompilerParams(dimension_semantics=("parallel",)),
        cost_estimate=pl.CostEstimate(flops=flops, transcendentals=0,
                                      bytes_accessed=bytes_accessed),
    )(x2, w2, scale, shift)


# --------------------------------------------------------------------------
# Public forward: NCHW in / NCHW out, matching the PyTorch module
# --------------------------------------------------------------------------
def downsample_conv_forward(x_nchw, params):
    w_oihw = params["w"]                       # (Cout, Cin, 1, 1)
    gamma = params["gamma"].astype(jnp.float32)
    beta = params["beta"].astype(jnp.float32)
    n, cin, h, w = x_nchw.shape
    cout = w_oihw.shape[0]

    # 1x1 stride-2 conv == strided spatial subsample + channel matmul (NHWC).
    x_nhwc = jnp.transpose(x_nchw, (0, 2, 3, 1)).astype(jnp.float32)
    x_sub = x_nhwc[:, ::2, ::2, :]
    ho, wo = x_sub.shape[1], x_sub.shape[2]
    m = n * ho * wo

    cin_p = _round_up(cin, LANE)
    cout_p = _round_up(cout, LANE)
    tile_m = TILE_M_MAX if m >= TILE_M_MAX else _round_up(m, 8)
    m_pad = _round_up(m, tile_m)
    num_tiles = m_pad // tile_m

    x2 = x_sub.reshape(m, cin)
    x2 = jnp.pad(x2, ((0, m_pad - m), (0, cin_p - cin))).astype(jnp.bfloat16)
    w2 = jnp.transpose(w_oihw.reshape(cout, cin), (1, 0))          # (Cin, Cout)
    w2 = jnp.pad(w2, ((0, cin_p - cin), (0, cout_p - cout))).astype(jnp.bfloat16)

    # Pass 1: per-tile partial statistics (conv output never hits HBM).
    partials = _run_stats(x2, w2, tile_m).reshape(num_tiles, 8, cout_p)

    # Tiny reduction over per-tile partials -> per-channel scale/shift (f32).
    sums = jnp.sum(partials[:, 0, :], axis=0)
    sumsq = jnp.sum(partials[:, 1, :], axis=0)
    mean = sums / m
    var = jnp.maximum(sumsq / m - mean * mean, 0.0)
    inv_std = jax.lax.rsqrt(var + BN_EPS)
    gamma_p = jnp.pad(gamma, (0, cout_p - cout))
    beta_p = jnp.pad(beta, (0, cout_p - cout))
    scale = (gamma_p * inv_std).reshape(1, cout_p).astype(jnp.float32)
    shift = (beta_p - mean * gamma_p * inv_std).reshape(1, cout_p).astype(jnp.float32)

    # Pass 2: fused conv matmul + BN affine.
    out = _run_conv_bn(x2, w2, scale, shift, tile_m)

    out = out[:m, :cout].reshape(n, ho, wo, cout)
    return jnp.transpose(out, (0, 3, 1, 2))            # back to NCHW


# --------------------------------------------------------------------------
# Pure-JAX reference (sanity check only)
# --------------------------------------------------------------------------
def _reference_forward(x_nchw, params):
    y = jax.lax.conv_general_dilated(
        x_nchw, params["w"], window_strides=(2, 2), padding="VALID",
        dimension_numbers=("NCHW", "OIHW", "NCHW"),
        precision=jax.lax.Precision.HIGHEST)
    mean = jnp.mean(y, axis=(0, 2, 3), keepdims=True)
    var = jnp.mean((y - mean) ** 2, axis=(0, 2, 3), keepdims=True)
    yhat = (y - mean) * jax.lax.rsqrt(var + BN_EPS)
    return (yhat * params["gamma"].reshape(1, -1, 1, 1)
            + params["beta"].reshape(1, -1, 1, 1))


# --------------------------------------------------------------------------
if __name__ == "__main__":
    key = jax.random.PRNGKey(0)
    N, CIN, H, W = 2, 4, 16, 16     # inplanes = 4
    COUT = 8                        # planes = 8 (typical 2x channel increase)

    kx, kw = jax.random.split(key, 2)
    x = jax.random.normal(kx, (N, CIN, H, W), dtype=jnp.float32)

    fan_in = CIN * 1 * 1
    params = {
        # Conv2d weight OIHW, kaiming-like scale, bias=False
        "w": jax.random.normal(kw, (COUT, CIN, 1, 1), jnp.float32) * (2.0 / fan_in) ** 0.5,
        # BatchNorm2d defaults: weight=1, bias=0
        "gamma": jnp.ones((COUT,), jnp.float32),
        "beta": jnp.zeros((COUT,), jnp.float32),
    }

    fwd = jax.jit(downsample_conv_forward)
    out = jax.block_until_ready(fwd(x, params))
    ref = jax.block_until_ready(_reference_forward(x, params))

    assert out.shape == (N, COUT, H // 2, W // 2), out.shape
    max_err = float(jnp.max(jnp.abs(out - ref)))
    assert jnp.allclose(out, ref, atol=2e-2, rtol=2e-2), max_err

    print("KERNEL_OK")
</pallas_src>

<mosaic_0001>
module attributes {stable_mosaic.version = 11 : i64} {
  func.func @_conv_stats_kernel(%arg0: i32, %arg1: memref<128x128xbf16, #tpu.memory_space<vmem>>, %arg2: memref<128x128xbf16, #tpu.memory_space<vmem>>, %arg3: memref<8x128xf32, #tpu.memory_space<vmem>>) attributes {dimension_semantics = [#tpu.dimension_semantics<parallel>], iteration_bounds = array<i64: 1>, scalar_prefetch = 0 : i64, scratch_operands = 0 : i64, tpu.core_type = #tpu.core_type<tc>, window_params = [{transform_indices = @transform_0, window_bounds = array<i64: 128, 128>}, {pipeline_mode = #tpu.pipeline_mode<synchronous>, transform_indices = @transform_1, window_bounds = array<i64: 128, 128>}, {transform_indices = @transform_2, window_bounds = array<i64: 8, 128>}]} {
    %c0 = arith.constant 0 : index
    %c0_0 = arith.constant 0 : index
    %0 = vector.load %arg1[%c0, %c0_0] : memref<128x128xbf16, #tpu.memory_space<vmem>>, vector<128x128xbf16>
    %c0_1 = arith.constant 0 : index
    %c0_2 = arith.constant 0 : index
    %1 = vector.load %arg2[%c0_1, %c0_2] : memref<128x128xbf16, #tpu.memory_space<vmem>>, vector<128x128xbf16>
    %cst = arith.constant dense<0.000000e+00> : vector<128x128xf32>
    %2 = tpu.matmul %0, %1, %cst {dimension_numbers = #tpu.dot_dimension_numbers<[1], [0], [0], [1], [0, 0, 1, 1], [], []>} : vector<128x128xbf16>, vector<128x128xbf16>, vector<128x128xf32> -> vector<128x128xf32>
    %cst_3 = arith.constant dense<0.000000e+00> : vector<128xf32>
    %3 = vector.multi_reduction <add>, %2, %cst_3 [0] : vector<128x128xf32> to vector<128xf32>
    %4 = vector.shape_cast %3 : vector<128xf32> to vector<1x128xf32>
    %5 = arith.mulf %2, %2 : vector<128x128xf32>
    %cst_4 = arith.constant dense<0.000000e+00> : vector<128xf32>
    %6 = vector.multi_reduction <add>, %5, %cst_4 [0] : vector<128x128xf32> to vector<128xf32>
    %7 = vector.shape_cast %6 : vector<128xf32> to vector<1x128xf32>
    %8 = tpu.iota {dimensions = array<i32: 0>} : vector<8x1xi32>
    %c0_i32 = arith.constant 0 : i32
    %9 = vector.broadcast %c0_i32 : i32 to vector<8x1xi32>
    %10 = arith.cmpi eq, %8, %9 : vector<8x1xi32>
    %cst_5 = arith.constant 0.000000e+00 : f32
    %11 = vector.shape_cast %10 : vector<8x1xi1> to vector<8x1xi1>
    %12 = vector.broadcast %11 : vector<8x1xi1> to vector<8x128xi1>
    %13 = vector.shape_cast %4 : vector<1x128xf32> to vector<1x128xf32>
    %14 = vector.broadcast %13 : vector<1x128xf32> to vector<8x128xf32>
    %15 = vector.broadcast %cst_5 : f32 to vector<8x128xf32>
    %16 = arith.select %12, %14, %15 : vector<8x128xi1>, vector<8x128xf32>
    %c1_i32 = arith.constant 1 : i32
    %17 = vector.broadcast %c1_i32 : i32 to vector<8x1xi32>
    %18 = arith.cmpi eq, %8, %17 : vector<8x1xi32>
    %cst_6 = arith.constant 0.000000e+00 : f32
    %19 = vector.shape_cast %18 : vector<8x1xi1> to vector<8x1xi1>
    %20 = vector.broadcast %19 : vector<8x1xi1> to vector<8x128xi1>
    %21 = vector.shape_cast %7 : vector<1x128xf32> to vector<1x128xf32>
    %22 = vector.broadcast %21 : vector<1x128xf32> to vector<8x128xf32>
    %23 = vector.broadcast %cst_6 : f32 to vector<8x128xf32>
    %24 = arith.select %20, %22, %23 : vector<8x128xi1>, vector<8x128xf32>
    %25 = arith.addf %16, %24 : vector<8x128xf32>
    %c0_7 = arith.constant 0 : index
    %c0_8 = arith.constant 0 : index
    %26 = vector.load %arg3[%c0_7, %c0_8] : memref<8x128xf32, #tpu.memory_space<vmem>>, vector<8x128xf32>
    tpu.vector_store %arg3[%c0_7, %c0_8], %25 {strides = array<i32>} : memref<8x128xf32, #tpu.memory_space<vmem>>, vector<8x128xf32>,
    return
  }
  func.func @transform_0(%arg0: i32) -> (i32, i32) {
    %c0_i32 = arith.constant 0 : i32
    %c0_i32_0 = arith.constant 0 : i32
    return %arg0, %c0_i32 : i32, i32
  }
  func.func @transform_1(%arg0: i32) -> (i32, i32) {
    %c0_i32 = arith.constant 0 : i32
    %c0_i32_0 = arith.constant 0 : i32
    %c0_i32_1 = arith.constant 0 : i32
    return %c0_i32, %c0_i32_0 : i32, i32
  }
  func.func @transform_2(%arg0: i32) -> (i32, i32) {
    %c0_i32 = arith.constant 0 : i32
    %c0_i32_0 = arith.constant 0 : i32
    return %arg0, %c0_i32 : i32, i32
  }
}

module attributes {stable_mosaic.version = 11 : i64} {
  func.func @_conv_bn_kernel(%arg0: i32, %arg1: memref<128x128xbf16, #tpu.memory_space<vmem>>, %arg2: memref<128x128xbf16, #tpu.memory_space<vmem>>, %arg3: memref<1x128xf32, #tpu.memory_space<vmem>>, %arg4: memref<1x128xf32, #tpu.memory_space<vmem>>, %arg5: memref<128x128xf32, #tpu.memory_space<vmem>>) attributes {dimension_semantics = [#tpu.dimension_semantics<parallel>], iteration_bounds = array<i64: 1>, scalar_prefetch = 0 : i64, scratch_operands = 0 : i64, tpu.core_type = #tpu.core_type<tc>, window_params = [{transform_indices = @transform_0, window_bounds = array<i64: 128, 128>}, {pipeline_mode = #tpu.pipeline_mode<synchronous>, transform_indices = @transform_1, window_bounds = array<i64: 128, 128>}, {pipeline_mode = #tpu.pipeline_mode<synchronous>, transform_indices = @transform_2, window_bounds = array<i64: 1, 128>}, {pipeline_mode = #tpu.pipeline_mode<synchronous>, transform_indices = @transform_3, window_bounds = array<i64: 1, 128>}, {transform_indices = @transform_4, window_bounds = array<i64: 128, 128>}]} {
    %c0 = arith.constant 0 : index
    %c0_0 = arith.constant 0 : index
    %0 = vector.load %arg1[%c0, %c0_0] : memref<128x128xbf16, #tpu.memory_space<vmem>>, vector<128x128xbf16>
    %c0_1 = arith.constant 0 : index
    %c0_2 = arith.constant 0 : index
    %1 = vector.load %arg2[%c0_1, %c0_2] : memref<128x128xbf16, #tpu.memory_space<vmem>>, vector<128x128xbf16>
    %cst = arith.constant dense<0.000000e+00> : vector<128x128xf32>
    %2 = tpu.matmul %0, %1, %cst {dimension_numbers = #tpu.dot_dimension_numbers<[1], [0], [0], [1], [0, 0, 1, 1], [], []>} : vector<128x128xbf16>, vector<128x128xbf16>, vector<128x128xf32> -> vector<128x128xf32>
    %c0_3 = arith.constant 0 : index
    %c0_4 = arith.constant 0 : index
    %3 = vector.load %arg3[%c0_3, %c0_4] : memref<1x128xf32, #tpu.memory_space<vmem>>, vector<1x128xf32>
    %4 = vector.broadcast %3 : vector<1x128xf32> to vector<128x128xf32>
    %5 = arith.mulf %2, %4 : vector<128x128xf32>
    %c0_5 = arith.constant 0 : index
    %c0_6 = arith.constant 0 : index
    %6 = vector.load %arg4[%c0_5, %c0_6] : memref<1x128xf32, #tpu.memory_space<vmem>>, vector<1x128xf32>
    %7 = vector.broadcast %6 : vector<1x128xf32> to vector<128x128xf32>
    %8 = arith.addf %5, %7 : vector<128x128xf32>
    %c0_7 = arith.constant 0 : index
    %c0_8 = arith.constant 0 : index
    %9 = vector.load %arg5[%c0_7, %c0_8] : memref<128x128xf32, #tpu.memory_space<vmem>>, vector<128x128xf32>
    tpu.vector_store %arg5[%c0_7, %c0_8], %8 {strides = array<i32>} : memref<128x128xf32, #tpu.memory_space<vmem>>, vector<128x128xf32>,
    return
  }
  func.func @transform_0(%arg0: i32) -> (i32, i32) {
    %c0_i32 = arith.constant 0 : i32
    %c0_i32_0 = arith.constant 0 : i32
    return %arg0, %c0_i32 : i32, i32
  }
  func.func @transform_1(%arg0: i32) -> (i32, i32) {
    %c0_i32 = arith.constant 0 : i32
    %c0_i32_0 = arith.constant 0 : i32
    %c0_i32_1 = arith.constant 0 : i32
    return %c0_i32, %c0_i32_0 : i32, i32
  }
  func.func @transform_2(%arg0: i32) -> (i32, i32) {
    %c0_i32 = arith.constant 0 : i32
    %c0_i32_0 = arith.constant 0 : i32
    %c0_i32_1 = arith.constant 0 : i32
    return %c0_i32, %c0_i32_0 : i32, i32
  }
  func.func @transform_3(%arg0: i32) -> (i32, i32) {
    %c0_i32 = arith.constant 0 : i32
    %c0_i32_0 = arith.constant 0 : i32
    %c0_i32_1 = arith.constant 0 : i32
    return %c0_i32, %c0_i32_0 : i32, i32
  }
  func.func @transform_4(%arg0: i32) -> (i32, i32) {
    %c0_i32 = arith.constant 0 : i32
    %c0_i32_0 = arith.constant 0 : i32
    return %arg0, %c0_i32 : i32, i32
  }
}

</mosaic_0001>

<bundles_post_ra>
// kernel: downsample_conv_forward.2
= control target key start
LH: loop header
LB: loop body
LE: loop exit
PB: predicated region body
PF: predicated region fallthrough
CT: control target
= control target key end

     0   :  { %s473_s1 = inlined_call_operand.vmem [shape: bf16[128,128], index: 1, kind: input, shape index: {}]   ;;  %s474_s0 = inlined_call_operand.vmem [shape: bf16[128,128], index: 0, kind: input, shape index: {}]   ;;  %s475_s2 = inlined_call_operand.vmem [shape: f32[8,128], index: 2, kind: output, shape index: {}]  }
   0x1   :  { %v391_v0 = vld [vmem:[%s473_s1 + $0x38] sm:$0xff]   ;;  %v392_v1 = vld [vmem:[%s473_s1 + $0x30] sm:$0xff]   ;;  %v393_v2 = vld [vmem:[%s473_s1 + $0x28] sm:$0xff]  }
   0x2   :  { %343 = vmatprep.subr.bf16.mxu0 %v391_v0  ;;  %375 = vmatprep.subr.bf16.mxu1 %v391_v0  ;;  %v394_v3 = vld [vmem:[%s473_s1 + $0x20] sm:$0xff]   ;;  %v395_v5 = vld [vmem:[%s473_s1 + $0x18] sm:$0xff]   ;;  %v396_v7 = vld [vmem:[%s473_s1 + $0x10] sm:$0xff]  }
   0x3   :  { %344 = vmatpush3.bf16.msra.mxu0 %v391_v0  ;;  %383 = vmatpush3.bf16.msra.mxu1 %v391_v0  ;;  %v399_v4 = vld [vmem:[%s474_s0] sm:$0xff]   ;;  %v397_v8 = vld [vmem:[%s473_s1 + $0x8] sm:$0xff]   ;;  %v401_v12 = vld [vmem:[%s474_s0 + $0x10] sm:$0xff]  }
   0x4   :  { %345 = vmatprep.subr.bf16.mxu0 %v392_v1  ;;  %376 = vmatprep.subr.bf16.mxu1 %v392_v1  ;;  %v403_v6 = vld [vmem:[%s474_s0 + $0x20] sm:$0xff]   ;;  %v400_v10 = vld [vmem:[%s474_s0 + $0x8] sm:$0xff]   ;;  %v405_v13 = vld [vmem:[%s474_s0 + $0x30] sm:$0xff]  }
   0x5   :  { %359 = vmatprep.mubr.bf16.mxu0 %v399_v4  ;;  %367 = vmatprep.mubr.bf16.mxu1 %v403_v6  ;;  %v398_v9 = vld [vmem:[%s473_s1] sm:$0xff]   ;;  %v404_v11 = vld [vmem:[%s474_s0 + $0x28] sm:$0xff]   ;;  %v402_v14 = vld [vmem:[%s474_s0 + $0x18] sm:$0xff]  }
   0x6   :  { %v406_v15 = vld [vmem:[%s474_s0 + $0x38] sm:$0xff]  }
   0x7   :  { %346 = vmatpush3.bf16.msra.mxu0 %v392_v1  ;;  %384 = vmatpush3.bf16.msra.mxu1 %v392_v1 }
   0x8   :  { %347 = vmatprep.subr.bf16.mxu0 %v393_v2  ;;  %377 = vmatprep.subr.bf16.mxu1 %v393_v2 }
   0xb   :  { %348 = vmatpush3.bf16.msra.mxu0 %v393_v2  ;;  %385 = vmatpush3.bf16.msra.mxu1 %v393_v2 }
   0xc   :  { %349 = vmatprep.subr.bf16.mxu0 %v394_v3  ;;  %378 = vmatprep.subr.bf16.mxu1 %v394_v3 }
   0xf   :  { %350 = vmatpush3.bf16.msra.mxu0 %v394_v3  ;;  %386 = vmatpush3.bf16.msra.mxu1 %v394_v3 }
  0x10   :  { %351 = vmatprep.subr.bf16.mxu0 %v395_v5  ;;  %379 = vmatprep.subr.bf16.mxu1 %v395_v5 }
  0x13   :  { %352 = vmatpush3.bf16.msra.mxu0 %v395_v5  ;;  %387 = vmatpush3.bf16.msra.mxu1 %v395_v5 }
  0x14   :  { %353 = vmatprep.subr.bf16.mxu0 %v396_v7  ;;  %380 = vmatprep.subr.bf16.mxu1 %v396_v7 }
  0x17   :  { %354 = vmatpush3.bf16.msra.mxu0 %v396_v7  ;;  %388 = vmatpush3.bf16.msra.mxu1 %v396_v7 }
  0x18   :  { %355 = vmatprep.subr.bf16.mxu0 %v397_v8  ;;  %381 = vmatprep.subr.bf16.mxu1 %v397_v8 }
  0x1b   :  { %356 = vmatpush3.bf16.msra.mxu0 %v397_v8  ;;  %389 = vmatpush3.bf16.msra.mxu1 %v397_v8 }
  0x1c   :  { %357 = vmatprep.subr.bf16.mxu0 %v398_v9  ;;  %382 = vmatprep.subr.bf16.mxu1 %v398_v9 }
  0x1f   :  { %358 = vmatpush3.bf16.msra.mxu0 %v398_v9  ;;  %390 = vmatpush3.bf16.msra.mxu1 %v398_v9 }
  0x22   :  { %360 = vmatmul.mubr.bf16.vlgmr.msra.gmra.mxu0 %v400_v10  ;;  %368 = vmatmul.mubr.bf16.vlgmr.msra.gmra.mxu1 %v404_v11 }
  0x23   :  { %363 = vmatprep.mubr.bf16.mxu0 %v401_v12  ;;  %371 = vmatprep.mubr.bf16.mxu1 %v405_v13 }
  0x2a   :  { %364 = vmatmul.mubr.bf16.gmra.mxu0 %v402_v14  ;;  %372 = vmatmul.mubr.bf16.gmra.mxu1 %v406_v15 }
  0xe2   :  { %v361_v16 = vpop.f32.mrf.mxu0  ;;  %v369_v17 = vpop.f32.mrf.mxu1 }
  0xe3   :  { %v260_v27 = vmul.f32 %v361_v16, %v361_v16  ;;  %v268_v58 = vmul.f32 %v369_v17, %v369_v17 }
  0xe4   :  { %v174_v18 = vpop.f32.mrf.mxu0  ;;  %v206_v20 = vpop.f32.mrf.mxu1 }
  0xe5   :  { %v258_v22 = vmul.f32 %v174_v18, %v174_v18  ;;  %v266_v51 = vmul.f32 %v206_v20, %v206_v20 }
  0xe6   :  { %v362_v19 = vpop.f32.mrf.mxu0  ;;  %v370_v26 = vpop.f32.mrf.mxu1 }
  0xe7   :  { %v261_v31 = vmul.f32 %v362_v19, %v362_v19  ;;  %v269_v61 = vmul.f32 %v370_v26, %v370_v26 }
  0xe8   :  { %v177_v21 = vpop.f32.mrf.mxu0  ;;  %v209_v35 = vpop.f32.mrf.mxu1 }
  0xe9   :  { %v237_v23 = vadd.f32 %v177_v21, %v174_v18  ;;  %v259_v24 = vmul.f32 %v177_v21, %v177_v21  ;;  %v267_v55 = vmul.f32 %v209_v35, %v209_v35 }
  0xea   :  { %v365_v25 = vpop.f32.mrf.mxu0  ;;  %v373_v43 = vpop.f32.mrf.mxu1 }
  0xeb   :  { %v238_v28 = vadd.f32 %v361_v16, %v237_v23  ;;  %v274_v29 = vadd.f32 %v259_v24, %v258_v22  ;;  %v264_v44 = vmul.f32 %v365_v25, %v365_v25  ;;  %v272_v7 = vmul.f32 %v373_v43, %v373_v43 }
  0xec   :  { %v190_v30 = vpop.f32.mrf.mxu0  ;;  %v222_v50 = vpop.f32.mrf.mxu1 }
  0xed   :  { %v275_v32 = vadd.f32 %v274_v29, %v260_v27  ;;  %v239_v33 = vadd.f32 %v362_v19, %v238_v28  ;;  %v262_v37 = vmul.f32 %v190_v30, %v190_v30  ;;  %v270_v2 = vmul.f32 %v222_v50, %v222_v50 }
  0xee   :  { %v366_v34 = vpop.f32.mrf.mxu0  ;;  %v374_v57 = vpop.f32.mrf.mxu1 }
  0xef   :  { %v240_v36 = vadd.f32 %v239_v33, %v190_v30  ;;  %v276_v38 = vadd.f32 %v275_v32, %v261_v31  ;;  %v265_v47 = vmul.f32 %v366_v34, %v366_v34  ;;  %v273_v10 = vmul.f32 %v374_v57, %v374_v57 }
  0xf0   :  { %v193_v39 = vpop.f32.mrf.mxu0  ;;  %v225_v0 = vpop.f32.mrf.mxu1 }
  0xf1   :  { %v277_v40 = vadd.f32 %v276_v38, %v262_v37  ;;  %v241_v41 = vadd.f32 %v240_v36, %v193_v39  ;;  %v263_v42 = vmul.f32 %v193_v39, %v193_v39  ;;  %v271_v6 = vmul.f32 %v225_v0, %v225_v0 }
  0xf3   :  { %v242_v45 = vadd.f32 %v365_v25, %v241_v41  ;;  %v278_v46 = vadd.f32 %v277_v40, %v263_v42 }
  0xf5   :  { %v243_v48 = vadd.f32 %v366_v34, %v242_v45  ;;  %v279_v49 = vadd.f32 %v278_v46, %v264_v44 }
  0xf7   :  { %v280_v52 = vadd.f32 %v279_v49, %v265_v47  ;;  %v244_v53 = vadd.f32 %v243_v48, %v206_v20 }
  0xf9   :  { %v245_v54 = vadd.f32 %v244_v53, %v209_v35  ;;  %v281_v56 = vadd.f32 %v280_v52, %v266_v51 }
  0xfb   :  { %v246_v59 = vadd.f32 %v369_v17, %v245_v54  ;;  %v282_v60 = vadd.f32 %v281_v56, %v267_v55  ;;  %v295_v17 = vlaneseq }
  0xfd   :  { %v283_v62 = vadd.f32 %v282_v60, %v268_v58  ;;  %v247_v63 = vadd.f32 %v370_v26, %v246_v59  ;;  %v296_v22 = vshrl.u32 %v295_v17, 7 }
  0xff   :  { %v248_v1 = vadd.f32 %v247_v63, %v222_v50  ;;  %v284_v3 = vadd.f32 %v283_v62, %v269_v61  ;;  %vm297_vm0 = vcmp.eq.s32.totalorder %v296_v22, 0  ;;  %vm301_vm1 = vcmp.eq.s32.totalorder %v296_v22, 1 }
 0x101   :  { %v285_v4 = vadd.f32 %v284_v3, %v270_v2  ;;  %v249_v5 = vadd.f32 %v248_v1, %v225_v0 }
 0x103   :  { %v250_v8 = vadd.f32 %v373_v43, %v249_v5  ;;  %v286_v9 = vadd.f32 %v285_v4, %v271_v6 }
 0x105   :  { %v251_v11 = vadd.f32 %v374_v57, %v250_v8  ;;  %v287_v12 = vadd.f32 %v286_v9, %v272_v7 }
 0x107   :  { %v252_v13 = vrot.slane %v251_v11, 4  ;;  %v288_v14 = vadd.f32 %v287_v12, %v273_v10 }
 0x109   :  { %v253_v15 = vadd.f32 %v252_v13, %v251_v11  ;;  %v289_v16 = vrot.slane %v288_v14, 4 }
 0x10b   :  { %v254_v18 = vrot.slane %v253_v15, 2  ;;  %v290_v19 = vadd.f32 %v289_v16, %v288_v14 }
 0x10d   :  { %v255_v20 = vadd.f32 %v254_v18, %v253_v15  ;;  %v291_v21 = vrot.slane %v290_v19, 2 }
 0x10f   :  { %v256_v23 = vrot.slane %v255_v20, 1  ;;  %v292_v24 = vadd.f32 %v291_v21, %v290_v19 }
 0x111   :  { %v257_v25 = vadd.f32 %v256_v23, %v255_v20  ;;  %v293_v26 = vrot.slane %v292_v24, 1 }
 0x113   :  { %v294_v27 = vadd.f32 %v293_v26, %v292_v24  ;;  %v300_v28 = vsel %vm297_vm0, %v257_v25, 0.0 }
 0x115   :  { %v304_v29 = vsel %vm301_vm1, %v294_v27, 0.0 }
 0x116   :  { %v305_v30 = vadd.f32 %v304_v29, %v300_v28 }
 0x118   :  { %306 = vst [vmem:[%s475_s2] sm:$0xff] %v305_v30 }

// kernel: downsample_conv_forward.3
= control target key start
LH: loop header
LB: loop body
LE: loop exit
PB: predicated region body
PF: predicated region fallthrough
CT: control target
= control target key end

     0   :  { %s534_s1 = inlined_call_operand.vmem [shape: bf16[128,128], index: 1, kind: input, shape index: {}]   ;;  %s535_s0 = inlined_call_operand.vmem [shape: bf16[128,128], index: 0, kind: input, shape index: {}]   ;;  %s536_s2 = inlined_call_operand.vmem [shape: f32[1,128], index: 2, kind: input, shape index: {}]   ;;  %s537_s3 = inlined_call_operand.vmem [shape: f32[1,128], index: 3, kind: input, shape index: {}]   ;;  %s538_s4 = inlined_call_operand.vmem [shape: f32[128,128], index: 4, kind: output, shape index: {}]  }
   0x1   :  { %v391_v0 = vld [vmem:[%s534_s1 + $0x38] sm:$0xff]   ;;  %v392_v1 = vld [vmem:[%s534_s1 + $0x30] sm:$0xff]   ;;  %v393_v2 = vld [vmem:[%s534_s1 + $0x28] sm:$0xff]  }
   0x2   :  { %343 = vmatprep.subr.bf16.mxu0 %v391_v0  ;;  %375 = vmatprep.subr.bf16.mxu1 %v391_v0  ;;  %v394_v3 = vld [vmem:[%s534_s1 + $0x20] sm:$0xff]   ;;  %v395_v6 = vld [vmem:[%s534_s1 + $0x18] sm:$0xff]   ;;  %v396_v7 = vld [vmem:[%s534_s1 + $0x10] sm:$0xff]  }
   0x3   :  { %344 = vmatpush3.bf16.msra.mxu0 %v391_v0  ;;  %383 = vmatpush3.bf16.msra.mxu1 %v391_v0  ;;  %v399_v4 = vld [vmem:[%s535_s0] sm:$0xff]   ;;  %v397_v8 = vld [vmem:[%s534_s1 + $0x8] sm:$0xff]   ;;  %v403_v12 = vld [vmem:[%s535_s0 + $0x10] sm:$0xff]  }
   0x4   :  { %345 = vmatprep.subr.bf16.mxu0 %v392_v1  ;;  %376 = vmatprep.subr.bf16.mxu1 %v392_v1  ;;  %v400_v5 = vld [vmem:[%s535_s0 + $0x20] sm:$0xff]   ;;  %v401_v10 = vld [vmem:[%s535_s0 + $0x8] sm:$0xff]   ;;  %v404_v13 = vld [vmem:[%s535_s0 + $0x30] sm:$0xff]  }
   0x5   :  { %359 = vmatprep.mubr.bf16.mxu0 %v399_v4  ;;  %367 = vmatprep.mubr.bf16.mxu1 %v400_v5  ;;  %v398_v9 = vld [vmem:[%s534_s1] sm:$0xff]   ;;  %v402_v11 = vld [vmem:[%s535_s0 + $0x28] sm:$0xff]   ;;  %v405_v14 = vld [vmem:[%s535_s0 + $0x18] sm:$0xff]  }
   0x6   :  { %v406_v15 = vld [vmem:[%s535_s0 + $0x38] sm:$0xff]   ;;  %v325_v16 = vld [vmem:[%s536_s2] ss:$0 sm:$0xff] }
   0x7   :  { %346 = vmatpush3.bf16.msra.mxu0 %v392_v1  ;;  %384 = vmatpush3.bf16.msra.mxu1 %v392_v1  ;;  %v326_v18 = vld [vmem:[%s537_s3] ss:$0 sm:$0xff] }
   0x8   :  { %347 = vmatprep.subr.bf16.mxu0 %v393_v2  ;;  %377 = vmatprep.subr.bf16.mxu1 %v393_v2 }
   0xb   :  { %348 = vmatpush3.bf16.msra.mxu0 %v393_v2  ;;  %385 = vmatpush3.bf16.msra.mxu1 %v393_v2 }
   0xc   :  { %349 = vmatprep.subr.bf16.mxu0 %v394_v3  ;;  %378 = vmatprep.subr.bf16.mxu1 %v394_v3 }
   0xf   :  { %350 = vmatpush3.bf16.msra.mxu0 %v394_v3  ;;  %386 = vmatpush3.bf16.msra.mxu1 %v394_v3 }
  0x10   :  { %351 = vmatprep.subr.bf16.mxu0 %v395_v6  ;;  %379 = vmatprep.subr.bf16.mxu1 %v395_v6 }
  0x13   :  { %352 = vmatpush3.bf16.msra.mxu0 %v395_v6  ;;  %387 = vmatpush3.bf16.msra.mxu1 %v395_v6 }
  0x14   :  { %353 = vmatprep.subr.bf16.mxu0 %v396_v7  ;;  %380 = vmatprep.subr.bf16.mxu1 %v396_v7 }
  0x17   :  { %354 = vmatpush3.bf16.msra.mxu0 %v396_v7  ;;  %388 = vmatpush3.bf16.msra.mxu1 %v396_v7 }
  0x18   :  { %355 = vmatprep.subr.bf16.mxu0 %v397_v8  ;;  %381 = vmatprep.subr.bf16.mxu1 %v397_v8 }
  0x1b   :  { %356 = vmatpush3.bf16.msra.mxu0 %v397_v8  ;;  %389 = vmatpush3.bf16.msra.mxu1 %v397_v8 }
  0x1c   :  { %357 = vmatprep.subr.bf16.mxu0 %v398_v9  ;;  %382 = vmatprep.subr.bf16.mxu1 %v398_v9 }
  0x1f   :  { %358 = vmatpush3.bf16.msra.mxu0 %v398_v9  ;;  %390 = vmatpush3.bf16.msra.mxu1 %v398_v9 }
  0x22   :  { %360 = vmatmul.mubr.bf16.vlgmr.msra.gmra.mxu0 %v401_v10  ;;  %368 = vmatmul.mubr.bf16.vlgmr.msra.gmra.mxu1 %v402_v11 }
  0x23   :  { %363 = vmatprep.mubr.bf16.mxu0 %v403_v12  ;;  %371 = vmatprep.mubr.bf16.mxu1 %v404_v13 }
  0x2a   :  { %364 = vmatmul.mubr.bf16.gmra.mxu0 %v405_v14  ;;  %372 = vmatmul.mubr.bf16.gmra.mxu1 %v406_v15 }
  0xe2   :  { %v361_v17 = vpop.f32.mrf.mxu0  ;;  %v369_v19 = vpop.f32.mrf.mxu1 }
  0xe3   :  { %v252_v20 = vmul.f32 %v361_v17, %v325_v16  ;;  %v260_v21 = vmul.f32 %v369_v19, %v325_v16 }
  0xe4   :  { %v180_v22 = vpop.f32.mrf.mxu0  ;;  %v212_v23 = vpop.f32.mrf.mxu1 }
  0xe5   :  { %v275_v24 = vadd.f32 %v326_v18, %v252_v20  ;;  %v283_v25 = vadd.f32 %v326_v18, %v260_v21  ;;  %v250_v26 = vmul.f32 %v325_v16, %v180_v22  ;;  %v258_v27 = vmul.f32 %v325_v16, %v212_v23 }
  0xe6   :  { %v362_v28 = vpop.f32.mrf.mxu0  ;;  %v370_v29 = vpop.f32.mrf.mxu1 }
  0xe7   :  { %291 = vst [vmem:[%s538_s4 + $0x10] sm:$0xff] %v275_v24  ;;  %299 = vst [vmem:[%s538_s4 + $0x50] sm:$0xff] %v283_v25  ;;  %v273_v30 = vadd.f32 %v326_v18, %v250_v26  ;;  %v281_v31 = vadd.f32 %v326_v18, %v258_v27  ;;  %v253_v32 = vmul.f32 %v362_v28, %v325_v16 }
  0xe8   :  { %v261_v33 = vmul.f32 %v370_v29, %v325_v16  ;;  %v183_v34 = vpop.f32.mrf.mxu0  ;;  %v215_v35 = vpop.f32.mrf.mxu1 }
  0xe9   :  { %289 = vst [vmem:[%s538_s4] sm:$0xff] %v273_v30  ;;  %297 = vst [vmem:[%s538_s4 + $0x40] sm:$0xff] %v281_v31  ;;  %v276_v36 = vadd.f32 %v326_v18, %v253_v32  ;;  %v251_v38 = vmul.f32 %v325_v16, %v183_v34  ;;  %v259_v39 = vmul.f32 %v325_v16, %v215_v35 }
  0xea   :  { %v284_v37 = vadd.f32 %v326_v18, %v261_v33  ;;  %v365_v40 = vpop.f32.mrf.mxu0  ;;  %v373_v41 = vpop.f32.mrf.mxu1 }
  0xeb   :  { %292 = vst [vmem:[%s538_s4 + $0x18] sm:$0xff] %v276_v36  ;;  %v274_v42 = vadd.f32 %v326_v18, %v251_v38  ;;  %v282_v43 = vadd.f32 %v326_v18, %v259_v39  ;;  %v256_v44 = vmul.f32 %v365_v40, %v325_v16  ;;  %v264_v45 = vmul.f32 %v373_v41, %v325_v16 }
  0xec   :  { %300 = vst [vmem:[%s538_s4 + $0x58] sm:$0xff] %v284_v37  ;;  %v196_v46 = vpop.f32.mrf.mxu0  ;;  %v228_v47 = vpop.f32.mrf.mxu1 }
  0xed   :  { %290 = vst [vmem:[%s538_s4 + $0x8] sm:$0xff] %v274_v42  ;;  %298 = vst [vmem:[%s538_s4 + $0x48] sm:$0xff] %v282_v43  ;;  %v279_v48 = vadd.f32 %v326_v18, %v256_v44  ;;  %v287_v49 = vadd.f32 %v326_v18, %v264_v45  ;;  %v254_v50 = vmul.f32 %v325_v16, %v196_v46 }
  0xee   :  { %v262_v51 = vmul.f32 %v325_v16, %v228_v47  ;;  %v366_v52 = vpop.f32.mrf.mxu0  ;;  %v374_v53 = vpop.f32.mrf.mxu1 }
  0xef   :  { %295 = vst [vmem:[%s538_s4 + $0x30] sm:$0xff] %v279_v48  ;;  %303 = vst [vmem:[%s538_s4 + $0x70] sm:$0xff] %v287_v49  ;;  %v277_v54 = vadd.f32 %v326_v18, %v254_v50  ;;  %v257_v56 = vmul.f32 %v366_v52, %v325_v16  ;;  %v265_v57 = vmul.f32 %v374_v53, %v325_v16 }
  0xf0   :  { %v285_v55 = vadd.f32 %v326_v18, %v262_v51  ;;  %v199_v58 = vpop.f32.mrf.mxu0  ;;  %v231_v59 = vpop.f32.mrf.mxu1 }
  0xf1   :  { %293 = vst [vmem:[%s538_s4 + $0x20] sm:$0xff] %v277_v54  ;;  %v280_v60 = vadd.f32 %v326_v18, %v257_v56  ;;  %v288_v61 = vadd.f32 %v326_v18, %v265_v57  ;;  %v255_v62 = vmul.f32 %v325_v16, %v199_v58  ;;  %v263_v63 = vmul.f32 %v325_v16, %v231_v59 }
  0xf2   :  { %301 = vst [vmem:[%s538_s4 + $0x60] sm:$0xff] %v285_v55 }
  0xf3   :  { %296 = vst [vmem:[%s538_s4 + $0x38] sm:$0xff] %v280_v60  ;;  %304 = vst [vmem:[%s538_s4 + $0x78] sm:$0xff] %v288_v61  ;;  %v278_v0 = vadd.f32 %v326_v18, %v255_v62  ;;  %v286_v1 = vadd.f32 %v326_v18, %v263_v63 }
  0xf5   :  { %294 = vst [vmem:[%s538_s4 + $0x28] sm:$0xff] %v278_v0  ;;  %302 = vst [vmem:[%s538_s4 + $0x68] sm:$0xff] %v286_v1 }

</bundles_post_ra>
